<compile_context>
chip_gen: v5e
topology: v5e:2x2
jax: 0.10.0
libtpu: 0.0.40
codegen_flags: <defaults>
</compile_context>

<pallas_src>
import jax
import jax.numpy as jnp
from jax.experimental import pallas as pl
from jax.experimental.pallas import tpu as pltpu

IN_FEATURES = 3
OUT_FEATURES = 4

# Lane-dense batch tile (rows map to the 128-lane axis).  64K f32 rows:
#   in  block (3, TB): 768 KiB real / 2 MiB sublane-padded in VMEM
#   out block (4, TB): 1 MiB  real / 2 MiB sublane-padded in VMEM
# double-buffered total ~8 MiB -> fits v5e's 16 MiB default scoped VMEM and v7x's
# halved VMEM budget while making per-step DMA >> the ~0.35 us grid-step overhead.
_BATCH_TILE = 64 * 1024


def _linear_sigmoid_kernel(w_ref, b_ref, x_ref, o_ref):
    """out[j, :] = sigmoid(sum_k w[j, k] * x[k, :] + b[j]).

    w_ref: (4, 3) f32 in SMEM     b_ref: (4,) f32 in SMEM
    x_ref: (3, TB) in VMEM (x^T)  o_ref: (4, TB) in VMEM (out^T)
    """
    # Load the three feature rows once; each is a lane-dense vector of length TB.
    x0 = x_ref[0:1, :].astype(jnp.float32)
    x1 = x_ref[1:2, :].astype(jnp.float32)
    x2 = x_ref[2:3, :].astype(jnp.float32)
    for j in range(OUT_FEATURES):  # static unroll: 4 output rows
        y = (w_ref[j, 0] * x0 + w_ref[j, 1] * x1 + w_ref[j, 2] * x2 + b_ref[j])
        # sigmoid(y) = 0.5 * tanh(0.5 * y) + 0.5  (single EUP op, stable for any |y|)
        o_ref[j:j + 1, :] = (0.5 * jnp.tanh(0.5 * y) + 0.5).astype(o_ref.dtype)


def _forward_transposed(x_t, w, b, batch_tile):
    """x_t: (3, B) -> out^T: (4, B)."""
    batch = x_t.shape[1]
    smem_spec = pl.BlockSpec(memory_space=pltpu.MemorySpace.SMEM)

    if batch <= batch_tile:
        # Grid-less: whole arrays as single VMEM blocks (last dim == full array dim,
        # so no 128-divisibility requirement).  Minimal launch scaffolding.
        # TODO(synk): for very small B this is launch-latency bound; a fused XLA
        # sigmoid(x @ W.T + b) may win — kept as Pallas per task spec.
        return pl.pallas_call(
            _linear_sigmoid_kernel,
            out_shape=jax.ShapeDtypeStruct((OUT_FEATURES, batch), x_t.dtype),
            in_specs=[
                smem_spec,
                smem_spec,
                pl.BlockSpec(memory_space=pltpu.MemorySpace.VMEM),
            ],
            out_specs=pl.BlockSpec(memory_space=pltpu.MemorySpace.VMEM),
        )(w, b, x_t)

    # Batch-tiled grid: blocks software-pipeline (DMA/compute overlap) and the
    # "parallel" axis shards tiles across TensorCores on multi-TC chips (v7x).
    # No wrapper-side pad / slice: Pallas masks the ragged last block itself.
    grid = (pl.cdiv(batch, batch_tile),)
    return pl.pallas_call(
        _linear_sigmoid_kernel,
        out_shape=jax.ShapeDtypeStruct((OUT_FEATURES, batch), x_t.dtype),
        grid=grid,
        in_specs=[
            smem_spec,
            smem_spec,
            pl.BlockSpec((IN_FEATURES, batch_tile), lambda i: (0, i)),
        ],
        out_specs=pl.BlockSpec((OUT_FEATURES, batch_tile), lambda i: (0, i)),
        compiler_params=pltpu.CompilerParams(
            dimension_semantics=("parallel",),
            vmem_limit_bytes=32 * 1024 * 1024,
        ),
    )(w, b, x_t)


def my_model_forward(x, weight, bias, *, batch_tile=_BATCH_TILE):
    """Equivalent of MyModel.forward: sigmoid(x @ W.T + b).

    x: (B, 3), weight: (4, 3) (nn.Linear.weight layout), bias: (4,).
    """
    w = weight.astype(jnp.float32)   # SMEM holds 32-bit scalars
    b = bias.astype(jnp.float32)
    # Layout plumbing (not compute): present a lane-dense (features, batch) slab to the
    # kernel so the batch dimension maps onto the 128-lane axis.
    x_t = x.T                                              # (3, B)
    out_t = _forward_transposed(x_t, w, b, batch_tile)     # (4, B)
    return out_t.T                                         # (B, 4)


if __name__ == "__main__":
    key = jax.random.PRNGKey(0)
    kx, kw, kb, kx2 = jax.random.split(key, 4)

    # Deterministic parameter init (mimics nn.Linear's uniform(-1/sqrt(in), 1/sqrt(in))).
    bound = 1.0 / (IN_FEATURES ** 0.5)
    weight = jax.random.uniform(
        kw, (OUT_FEATURES, IN_FEATURES), jnp.float32, minval=-bound, maxval=bound
    )
    bias = jax.random.uniform(
        kb, (OUT_FEATURES,), jnp.float32, minval=-bound, maxval=bound
    )

    # Small-batch path (grid-less, single lane-dense block).
    batch = 8
    x = jax.random.normal(kx, (batch, IN_FEATURES), jnp.float32)
    out = my_model_forward(x, weight, bias)
    jax.block_until_ready(out)
    ref = jax.nn.sigmoid(x @ weight.T + bias)
    assert out.shape == (batch, OUT_FEATURES)
    assert jnp.allclose(out, ref, atol=1e-5, rtol=1e-5), "mismatch vs reference (small batch)"

    # Tiled path: small tile override to exercise the grid + ragged last block cheaply
    # (1040 = 4 * 256 + 16, so the final block is Pallas-masked).
    big_batch = 1040
    xb = jax.random.normal(kx2, (big_batch, IN_FEATURES), jnp.float32)
    out_b = my_model_forward(xb, weight, bias, batch_tile=256)
    jax.block_until_ready(out_b)
    ref_b = jax.nn.sigmoid(xb @ weight.T + bias)
    assert out_b.shape == (big_batch, OUT_FEATURES)
    assert jnp.allclose(out_b, ref_b, atol=1e-5, rtol=1e-5), "mismatch vs reference (tiled batch)"

    print("KERNEL_OK")
</pallas_src>

<mosaic_0001>
module attributes {stable_mosaic.version = 11 : i64} {
  func.func @_linear_sigmoid_kernel(%arg0: memref<4x3xf32, #tpu.memory_space<smem>>, %arg1: memref<4xf32, #tpu.memory_space<smem>>, %arg2: memref<3x8xf32, #tpu.memory_space<vmem>>, %arg3: memref<4x8xf32, #tpu.memory_space<vmem>>) attributes {dimension_semantics = [], scalar_prefetch = 0 : i64, scratch_operands = 0 : i64, tpu.core_type = #tpu.core_type<tc>} {
    %c0 = arith.constant 0 : index
    %c0_0 = arith.constant 0 : index
    %0 = vector.load %arg2[%c0, %c0_0] : memref<3x8xf32, #tpu.memory_space<vmem>>, vector<1x8xf32>
    %c1 = arith.constant 1 : index
    %c0_1 = arith.constant 0 : index
    %1 = vector.load %arg2[%c1, %c0_1] : memref<3x8xf32, #tpu.memory_space<vmem>>, vector<1x8xf32>
    %c2 = arith.constant 2 : index
    %c0_2 = arith.constant 0 : index
    %2 = vector.load %arg2[%c2, %c0_2] : memref<3x8xf32, #tpu.memory_space<vmem>>, vector<1x8xf32>
    %c0_3 = arith.constant 0 : index
    %c0_4 = arith.constant 0 : index
    %3 = memref.load %arg0[%c0_3, %c0_4] : memref<4x3xf32, #tpu.memory_space<smem>>
    %4 = vector.broadcast %3 : f32 to vector<1x8xf32>
    %5 = arith.mulf %4, %0 : vector<1x8xf32>
    %c0_5 = arith.constant 0 : index
    %c1_6 = arith.constant 1 : index
    %6 = memref.load %arg0[%c0_5, %c1_6] : memref<4x3xf32, #tpu.memory_space<smem>>
    %7 = vector.broadcast %6 : f32 to vector<1x8xf32>
    %8 = arith.mulf %7, %1 : vector<1x8xf32>
    %9 = arith.addf %5, %8 : vector<1x8xf32>
    %c0_7 = arith.constant 0 : index
    %c2_8 = arith.constant 2 : index
    %10 = memref.load %arg0[%c0_7, %c2_8] : memref<4x3xf32, #tpu.memory_space<smem>>
    %11 = vector.broadcast %10 : f32 to vector<1x8xf32>
    %12 = arith.mulf %11, %2 : vector<1x8xf32>
    %13 = arith.addf %9, %12 : vector<1x8xf32>
    %c0_9 = arith.constant 0 : index
    %14 = memref.load %arg1[%c0_9] : memref<4xf32, #tpu.memory_space<smem>>
    %15 = vector.broadcast %14 : f32 to vector<1x8xf32>
    %16 = arith.addf %13, %15 : vector<1x8xf32>
    %cst = arith.constant 5.000000e-01 : f32
    %17 = vector.broadcast %cst : f32 to vector<1x8xf32>
    %18 = arith.mulf %17, %16 : vector<1x8xf32>
    %19 = math.tanh %18 : vector<1x8xf32>
    %cst_10 = arith.constant 5.000000e-01 : f32
    %20 = vector.broadcast %cst_10 : f32 to vector<1x8xf32>
    %21 = arith.mulf %20, %19 : vector<1x8xf32>
    %cst_11 = arith.constant 5.000000e-01 : f32
    %22 = vector.broadcast %cst_11 : f32 to vector<1x8xf32>
    %23 = arith.addf %21, %22 : vector<1x8xf32>
    %c0_12 = arith.constant 0 : index
    %c0_13 = arith.constant 0 : index
    %24 = vector.load %arg3[%c0_12, %c0_13] : memref<4x8xf32, #tpu.memory_space<vmem>>, vector<1x8xf32>
    tpu.vector_store %arg3[%c0_12, %c0_13], %23 {strides = array<i32>} : memref<4x8xf32, #tpu.memory_space<vmem>>, vector<1x8xf32>,
    %c1_14 = arith.constant 1 : index
    %c0_15 = arith.constant 0 : index
    %25 = memref.load %arg0[%c1_14, %c0_15] : memref<4x3xf32, #tpu.memory_space<smem>>
    %26 = vector.broadcast %25 : f32 to vector<1x8xf32>
    %27 = arith.mulf %26, %0 : vector<1x8xf32>
    %c1_16 = arith.constant 1 : index
    %c1_17 = arith.constant 1 : index
    %28 = memref.load %arg0[%c1_16, %c1_17] : memref<4x3xf32, #tpu.memory_space<smem>>
    %29 = vector.broadcast %28 : f32 to vector<1x8xf32>
    %30 = arith.mulf %29, %1 : vector<1x8xf32>
    %31 = arith.addf %27, %30 : vector<1x8xf32>
    %c1_18 = arith.constant 1 : index
    %c2_19 = arith.constant 2 : index
    %32 = memref.load %arg0[%c1_18, %c2_19] : memref<4x3xf32, #tpu.memory_space<smem>>
    %33 = vector.broadcast %32 : f32 to vector<1x8xf32>
    %34 = arith.mulf %33, %2 : vector<1x8xf32>
    %35 = arith.addf %31, %34 : vector<1x8xf32>
    %c1_20 = arith.constant 1 : index
    %36 = memref.load %arg1[%c1_20] : memref<4xf32, #tpu.memory_space<smem>>
    %37 = vector.broadcast %36 : f32 to vector<1x8xf32>
    %38 = arith.addf %35, %37 : vector<1x8xf32>
    %cst_21 = arith.constant 5.000000e-01 : f32
    %39 = vector.broadcast %cst_21 : f32 to vector<1x8xf32>
    %40 = arith.mulf %39, %38 : vector<1x8xf32>
    %41 = math.tanh %40 : vector<1x8xf32>
    %cst_22 = arith.constant 5.000000e-01 : f32
    %42 = vector.broadcast %cst_22 : f32 to vector<1x8xf32>
    %43 = arith.mulf %42, %41 : vector<1x8xf32>
    %cst_23 = arith.constant 5.000000e-01 : f32
    %44 = vector.broadcast %cst_23 : f32 to vector<1x8xf32>
    %45 = arith.addf %43, %44 : vector<1x8xf32>
    %c1_24 = arith.constant 1 : index
    %c0_25 = arith.constant 0 : index
    %46 = vector.load %arg3[%c1_24, %c0_25] : memref<4x8xf32, #tpu.memory_space<vmem>>, vector<1x8xf32>
    tpu.vector_store %arg3[%c1_24, %c0_25], %45 {strides = array<i32>} : memref<4x8xf32, #tpu.memory_space<vmem>>, vector<1x8xf32>,
    %c2_26 = arith.constant 2 : index
    %c0_27 = arith.constant 0 : index
    %47 = memref.load %arg0[%c2_26, %c0_27] : memref<4x3xf32, #tpu.memory_space<smem>>
    %48 = vector.broadcast %47 : f32 to vector<1x8xf32>
    %49 = arith.mulf %48, %0 : vector<1x8xf32>
    %c2_28 = arith.constant 2 : index
    %c1_29 = arith.constant 1 : index
    %50 = memref.load %arg0[%c2_28, %c1_29] : memref<4x3xf32, #tpu.memory_space<smem>>
    %51 = vector.broadcast %50 : f32 to vector<1x8xf32>
    %52 = arith.mulf %51, %1 : vector<1x8xf32>
    %53 = arith.addf %49, %52 : vector<1x8xf32>
    %c2_30 = arith.constant 2 : index
    %c2_31 = arith.constant 2 : index
    %54 = memref.load %arg0[%c2_30, %c2_31] : memref<4x3xf32, #tpu.memory_space<smem>>
    %55 = vector.broadcast %54 : f32 to vector<1x8xf32>
    %56 = arith.mulf %55, %2 : vector<1x8xf32>
    %57 = arith.addf %53, %56 : vector<1x8xf32>
    %c2_32 = arith.constant 2 : index
    %58 = memref.load %arg1[%c2_32] : memref<4xf32, #tpu.memory_space<smem>>
    %59 = vector.broadcast %58 : f32 to vector<1x8xf32>
    %60 = arith.addf %57, %59 : vector<1x8xf32>
    %cst_33 = arith.constant 5.000000e-01 : f32
    %61 = vector.broadcast %cst_33 : f32 to vector<1x8xf32>
    %62 = arith.mulf %61, %60 : vector<1x8xf32>
    %63 = math.tanh %62 : vector<1x8xf32>
    %cst_34 = arith.constant 5.000000e-01 : f32
    %64 = vector.broadcast %cst_34 : f32 to vector<1x8xf32>
    %65 = arith.mulf %64, %63 : vector<1x8xf32>
    %cst_35 = arith.constant 5.000000e-01 : f32
    %66 = vector.broadcast %cst_35 : f32 to vector<1x8xf32>
    %67 = arith.addf %65, %66 : vector<1x8xf32>
    %c2_36 = arith.constant 2 : index
    %c0_37 = arith.constant 0 : index
    %68 = vector.load %arg3[%c2_36, %c0_37] : memref<4x8xf32, #tpu.memory_space<vmem>>, vector<1x8xf32>
    tpu.vector_store %arg3[%c2_36, %c0_37], %67 {strides = array<i32>} : memref<4x8xf32, #tpu.memory_space<vmem>>, vector<1x8xf32>,
    %c3 = arith.constant 3 : index
    %c0_38 = arith.constant 0 : index
    %69 = memref.load %arg0[%c3, %c0_38] : memref<4x3xf32, #tpu.memory_space<smem>>
    %70 = vector.broadcast %69 : f32 to vector<1x8xf32>
    %71 = arith.mulf %70, %0 : vector<1x8xf32>
    %c3_39 = arith.constant 3 : index
    %c1_40 = arith.constant 1 : index
    %72 = memref.load %arg0[%c3_39, %c1_40] : memref<4x3xf32, #tpu.memory_space<smem>>
    %73 = vector.broadcast %72 : f32 to vector<1x8xf32>
    %74 = arith.mulf %73, %1 : vector<1x8xf32>
    %75 = arith.addf %71, %74 : vector<1x8xf32>
    %c3_41 = arith.constant 3 : index
    %c2_42 = arith.constant 2 : index
    %76 = memref.load %arg0[%c3_41, %c2_42] : memref<4x3xf32, #tpu.memory_space<smem>>
    %77 = vector.broadcast %76 : f32 to vector<1x8xf32>
    %78 = arith.mulf %77, %2 : vector<1x8xf32>
    %79 = arith.addf %75, %78 : vector<1x8xf32>
    %c3_43 = arith.constant 3 : index
    %80 = memref.load %arg1[%c3_43] : memref<4xf32, #tpu.memory_space<smem>>
    %81 = vector.broadcast %80 : f32 to vector<1x8xf32>
    %82 = arith.addf %79, %81 : vector<1x8xf32>
    %cst_44 = arith.constant 5.000000e-01 : f32
    %83 = vector.broadcast %cst_44 : f32 to vector<1x8xf32>
    %84 = arith.mulf %83, %82 : vector<1x8xf32>
    %85 = math.tanh %84 : vector<1x8xf32>
    %cst_45 = arith.constant 5.000000e-01 : f32
    %86 = vector.broadcast %cst_45 : f32 to vector<1x8xf32>
    %87 = arith.mulf %86, %85 : vector<1x8xf32>
    %cst_46 = arith.constant 5.000000e-01 : f32
    %88 = vector.broadcast %cst_46 : f32 to vector<1x8xf32>
    %89 = arith.addf %87, %88 : vector<1x8xf32>
    %c3_47 = arith.constant 3 : index
    %c0_48 = arith.constant 0 : index
    %90 = vector.load %arg3[%c3_47, %c0_48] : memref<4x8xf32, #tpu.memory_space<vmem>>, vector<1x8xf32>
    tpu.vector_store %arg3[%c3_47, %c0_48], %89 {strides = array<i32>} : memref<4x8xf32, #tpu.memory_space<vmem>>, vector<1x8xf32>,
    return
  }
}

</mosaic_0001>

<bundles_post_ra>
// kernel: tpu_custom_call.1
= control target key start
LH: loop header
LB: loop body
LE: loop exit
PB: predicated region body
PF: predicated region fallthrough
CT: control target
= control target key end

     0   :  { %8 = vsyncpa [#allocation5], 0  ;;  %s305_s0 = inlined_call_operand.hbm [shape: f32[4,3], index: 0, kind: input, shape index: {}]   ;;  %s306_s1 = inlined_call_operand.hbm [shape: f32[4], index: 1, kind: input, shape index: {}]   ;;  %s307_s2 = inlined_call_operand.hbm [shape: f32[3,8], index: 2, kind: input, shape index: {}]   ;;  %s308_s3 = inlined_call_operand.hbm [shape: f32[4,8], index: 3, kind: output, shape index: {}]  }
   0x1   :  { %9 = vsyncpa [#allocation7], 0 }
   0x2   :  { %10 = vsyncpa [#allocation3], 0 }
   0x3   :  { %11 = vsyncpa [#allocation4], 0  ;;  %s17_s14 = sshll.u32 %s305_s0, 4  ;;  %s26_s17 = sshll.u32 %s306_s1, 4  ;;  %s18_s14 = int_to_ptr.hbm [resolvable:$true] %s17_s14  ;;  %s27_s17 = int_to_ptr.hbm [resolvable:$true] %s26_s17 }
   0x4   :  { %s259_s18 = smov [#allocation2]   ;;  %s260_s19 = smov [#allocation6]  }
   0x5   :  { %20 = dma.hbm_to_smem %s18_s14, 64, %s259_s18, [#allocation5]  }
   0x6   :  { %29 = dma.hbm_to_smem %s27_s17, 16, %s260_s19, [#allocation7]  }
   0x7   :  { %s35_s22 = sshll.u32 %s307_s2, 4  ;;  %s261_s23 = smov [#allocation8]   ;;  %s36_s22 = int_to_ptr.hbm [resolvable:$true] %s35_s22 }
   0x8   :  { %s37_s24 = sshll.u32 %s261_s23, 4  ;;  %s38_s24 = int_to_ptr.vmem [resolvable:$true] %s37_s24 }
   0x9   :  { %40 = dma.hbm_to_vmem [thread:$0]  %s36_s22, 64, %s38_s24, [#allocation3]  }
   0xa   :  { %251 = dma.done.wait [#allocation5], 64  }
   0xb   :  { %252 = vsyncadd [#allocation5], 4294967232 }
   0xc   :  { %253 = dma.done.wait [#allocation7], 16  }
   0xd   :  { %254 = vsyncadd [#allocation7], 4294967280 }
   0xe   :  { %255 = dma.done.wait [#allocation3], 64  }
   0xf   :  { %256 = vsyncadd [#allocation3], 4294967232 }
  0x10   :  { %53 = sfence }
  0x11   :  { %s57_s0 = sld [smem:[#allocation2]]  ;;  %v54_v0 = vld [vmem:[#allocation8] sm:$0x1]  ;;  %v55_v1 = vld [vmem:[#allocation8 + $0x1] sm:$0x1]  ;;  %vm75_vm0 = vcmask 57344  }
  0x12   :  { %s153_s1 = sld [smem:[#allocation2 + $0x1]]  ;;  %v56_v2 = vld [vmem:[#allocation8 + $0x2] sm:$0x1]  ;;  %s262_s11 = smov [#allocation9]  }
  0x13   :  { %s154_s25 = sld [smem:[#allocation2 + $0x2]]  ;;  %s139_s12 = sshll.u32 %s262_s11, 4  ;;  %s140_s12 = int_to_ptr.vmem [resolvable:$true] %s139_s12 }
  0x14   :  { %s68_s26 = sld [smem:[#allocation6]]  ;;  %s141_s15 = sshll.u32 %s308_s3, 4  ;;  %s142_s15 = int_to_ptr.hbm [resolvable:$true] %s141_s15 }
  0x15   :  { %s155_s27 = sld [smem:[#allocation2 + $0x80]] }
  0x16   :  { %s156_s2 = sld [smem:[#allocation2 + $0x81]] }
  0x17   :  { %v58_v3 = vstv %s57_s0  ;;  %s157_s28 = sld [smem:[#allocation2 + $0x82]] }
  0x18   :  { %v59_v4 = vmul.f32 %v58_v3, %v54_v0  ;;  %v61_v5 = vstv %s153_s1  ;;  %s292_s29 = sld [smem:[#allocation6 + $0x1]] }
  0x19   :  { %v62_v6 = vmul.f32 %v61_v5, %v55_v1  ;;  %v65_v7 = vstv %s154_s25  ;;  %s159_s30 = sld [smem:[#allocation2 + $0x100]] }
  0x1a   :  { %v66_v8 = vmul.f32 %v65_v7, %v56_v2  ;;  %s160_s4 = sld [smem:[#allocation2 + $0x101]]  ;;  %v69_v11 = vstv %s68_s26 }
  0x1b   :  { %v63_v9 = vadd.f32 %v62_v6, %v59_v4  ;;  %v78_v10 = vstv %s155_s27  ;;  %s161_s5 = sld [smem:[#allocation2 + $0x102]] }
  0x1c   :  { %v79_v12 = vmul.f32 %v78_v10, %v54_v0  ;;  %v81_v13 = vstv %s156_s2  ;;  %s294_s6 = sld [smem:[#allocation6 + $0x2]] }
  0x1d   :  { %v67_v14 = vadd.f32 %v66_v8, %v63_v9  ;;  %v82_v15 = vmul.f32 %v81_v13, %v55_v1  ;;  %v85_v16 = vstv %s157_s28  ;;  %s163_s7 = sld [smem:[#allocation2 + $0x180]] }
  0x1e   :  { %v86_v17 = vmul.f32 %v85_v16, %v56_v2  ;;  %s164_s8 = sld [smem:[#allocation2 + $0x181]]  ;;  %v89_v21 = vstv %s292_s29 }
  0x1f   :  { %v70_v18 = vadd.f32 %v69_v11, %v67_v14  ;;  %v83_v19 = vadd.f32 %v82_v15, %v79_v12  ;;  %v97_v20 = vstv %s159_s30  ;;  %s165_s9 = sld [smem:[#allocation2 + $0x182]] }
  0x20   :  { %v98_v22 = vmul.f32 %v97_v20, %v54_v0  ;;  %v100_v23 = vstv %s160_s4  ;;  %s166_s10 = sld [smem:[#allocation6 + $0x3]] }
  0x21   :  { %v71_v24 = vmul.f32 0.5, %v70_v18  ;;  %v87_v25 = vadd.f32 %v86_v17, %v83_v19  ;;  %v101_v26 = vmul.f32 %v100_v23, %v55_v1  ;;  %v104_v27 = vstv %s161_s5 }
  0x22   :  { %v105_v28 = vmul.f32 %v104_v27, %v56_v2  ;;  %v108_v32 = vstv %s294_s6 }
  0x23   :  { %171 = vtanh.f32 %v71_v24  ;;  %v90_v29 = vadd.f32 %v89_v21, %v87_v25  ;;  %v102_v30 = vadd.f32 %v101_v26, %v98_v22  ;;  %v116_v31 = vstv %s163_s7 }
  0x24   :  { %v117_v33 = vmul.f32 %v116_v31, %v54_v0  ;;  %v119_v34 = vstv %s164_s8 }
  0x25   :  { %v91_v35 = vmul.f32 0.5, %v90_v29  ;;  %v106_v36 = vadd.f32 %v105_v28, %v102_v30  ;;  %v120_v37 = vmul.f32 %v119_v34, %v55_v1  ;;  %v123_v38 = vstv %s165_s9 }
  0x26   :  { %v124_v39 = vmul.f32 %v123_v38, %v56_v2  ;;  %v127_v42 = vstv %s166_s10 }
  0x27   :  { %173 = vtanh.f32 %v91_v35  ;;  %v109_v40 = vadd.f32 %v108_v32, %v106_v36  ;;  %v121_v41 = vadd.f32 %v120_v37, %v117_v33 }
  0x29   :  { %v172_v43 = vpop.eup %171  ;;  %v110_v44 = vmul.f32 0.5, %v109_v40  ;;  %v125_v45 = vadd.f32 %v124_v39, %v121_v41 }
  0x2a   :  { %v73_v46 = vmul.f32 0.5, %v172_v43 }
  0x2b   :  { %175 = vtanh.f32 %v110_v44  ;;  %v128_v47 = vadd.f32 %v127_v42, %v125_v45 }
  0x2c   :  { %v74_v48 = vadd.f32 0.5, %v73_v46 }
  0x2d   :  { %v174_v49 = vpop.eup %173  ;;  %v129_v50 = vmul.f32 0.5, %v128_v47 }
  0x2e   :  { %76 = vst.msk [vmem:[#allocation9] sm:$0x1] %vm75_vm0, %v74_v48  ;;  %v93_v51 = vmul.f32 0.5, %v174_v49 }
  0x2f   :  { %177 = vtanh.f32 %v129_v50 }
  0x30   :  { %v94_v52 = vadd.f32 0.5, %v93_v51 }
  0x31   :  { %v176_v53 = vpop.eup %175 }
  0x32   :  { %95 = vst.msk [vmem:[#allocation9 + $0x1] sm:$0x1] %vm75_vm0, %v94_v52  ;;  %v112_v54 = vmul.f32 0.5, %v176_v53 }
  0x34   :  { %v113_v55 = vadd.f32 0.5, %v112_v54 }
  0x35   :  { %v178_v56 = vpop.eup %177 }
  0x36   :  { %114 = vst.msk [vmem:[#allocation9 + $0x2] sm:$0x1] %vm75_vm0, %v113_v55  ;;  %v131_v57 = vmul.f32 0.5, %v178_v56 }
  0x38   :  { %v132_v58 = vadd.f32 0.5, %v131_v57 }
  0x3a   :  { %133 = vst.msk [vmem:[#allocation9 + $0x3] sm:$0x1] %vm75_vm0, %v132_v58 }
  0x3b   :  { %144 = dma.vmem_to_hbm [thread:$0]  %s140_s12, 64, %s142_s15, [#allocation4]  }
  0x3c   :  { %257 = dma.done.wait [#allocation4], 64  }
  0x3d   :  { %258 = vsyncadd [#allocation4], 4294967232 }
  0x3e   :  { %149 = vsyncpa [#allocation3], 1 }
  0x3f   :  { %150 = vsyncpa [#allocation4], 1 }
  0x40   :  { %151 = vsyncpa [#allocation5], 1 }
  0x41   :  { %152 = vsyncpa [#allocation7], 1 }

</bundles_post_ra>
